<compile_context>
chip_gen: v7x
topology: tpu7x:2x2x1
jax: 0.10.0
libtpu: 0.0.40
codegen_flags: <defaults>
</compile_context>

<pallas_src>
import math

import jax
import jax.numpy as jnp
from jax.experimental import pallas as pl
from jax.experimental.pallas import tpu as pltpu

LN_EPS = 1e-5  # PyTorch nn.LayerNorm default eps


# ----------------------------------------------------------------------------
# Kernel helpers
# ----------------------------------------------------------------------------
def _gather_rows(ids_ref, tok_hbm, gbuf, sems, b, base, ts):
    """Issue TS row-gather DMAs (HBM table -> VMEM scratch), then wait all."""
    # Issue every gather first so all TS small DMAs are in flight together.
    for i in range(ts):
        tok = ids_ref[b, base + i]
        pltpu.make_async_copy(tok_hbm.at[tok], gbuf.at[i], sems.at[i]).start()
    # Wait for all of them (shape of the dummy src only sets the byte count).
    for i in range(ts):
        pltpu.make_async_copy(tok_hbm.at[0], gbuf.at[i], sems.at[i]).wait()


def _layernorm_rows(h, gamma, beta):
    """Single-pass LayerNorm over the last dim of a (TS, D) f32 slab."""
    mu = jnp.mean(h, axis=-1, keepdims=True)
    var = jnp.mean(h * h, axis=-1, keepdims=True) - mu * mu
    var = jnp.maximum(var, 0.0)
    hn = (h - mu) * jax.lax.rsqrt(var + LN_EPS)
    return hn * gamma + beta


def _make_kernel(ts, with_pe):
    if with_pe:
        def kernel(ids_ref, tok_hbm, pe_ref, gamma_ref, beta_ref, out_ref,
                   gbuf, sems):
            b = pl.program_id(0)
            s = pl.program_id(1)
            _gather_rows(ids_ref, tok_hbm, gbuf, sems, b, s * ts, ts)
            h = gbuf[...].astype(jnp.float32) + pe_ref[...]
            y = _layernorm_rows(h, gamma_ref[...], beta_ref[...])
            out_ref[...] = y[None].astype(out_ref.dtype)
    else:
        def kernel(ids_ref, tok_hbm, gamma_ref, beta_ref, out_ref,
                   gbuf, sems):
            b = pl.program_id(0)
            s = pl.program_id(1)
            _gather_rows(ids_ref, tok_hbm, gbuf, sems, b, s * ts, ts)
            h = gbuf[...].astype(jnp.float32)
            y = _layernorm_rows(h, gamma_ref[...], beta_ref[...])
            out_ref[...] = y[None].astype(out_ref.dtype)
    return kernel


# ----------------------------------------------------------------------------
# Host-side helpers
# ----------------------------------------------------------------------------
def make_positional_encoding(max_len: int, d_model: int) -> jnp.ndarray:
    """Matches PositionalEncoding.__init__ (sinusoidal, non-trainable)."""
    position = jnp.arange(max_len, dtype=jnp.float32)[:, None]
    div_term = jnp.exp(
        jnp.arange(0, d_model, 2, dtype=jnp.float32)
        * -(math.log(10000.0) / d_model)
    )
    pe = jnp.zeros((max_len, d_model), dtype=jnp.float32)
    pe = pe.at[:, 0::2].set(jnp.sin(position * div_term))
    pe = pe.at[:, 1::2].set(jnp.cos(position * div_term))
    return pe


def _pick_token_tile(S: int) -> int:
    """Largest divisor of S that is <= 256 and sublane-friendly."""
    best = 1
    for t in range(1, min(S, 256) + 1):
        if S % t == 0 and (t % 8 == 0 or t == S):
            best = max(best, t)
    return best


def embedding_forward(ids, tok_table, pe, gamma, beta, *,
                      if_posiemb=True, token_tile=None):
    """ids: (B, S) int32; tok_table: (V, D); pe: (>=S, D); gamma/beta: (1, D)."""
    B, S = ids.shape
    V, D = tok_table.shape

    TS = _pick_token_tile(S) if token_tile is None else token_tile
    assert S % TS == 0, "token tile must divide sequence length"
    n_s_tiles = S // TS

    gamma2 = jnp.reshape(gamma, (1, D)).astype(jnp.float32)
    beta2 = jnp.reshape(beta, (1, D)).astype(jnp.float32)

    # Embedding table stays in HBM; rows are gathered with manual DMAs.
    in_specs = [pl.BlockSpec(memory_space=pl.ANY)]
    operands = [tok_table]

    if if_posiemb:
        assert pe.shape[0] >= S and pe.shape[1] == D
        pe_s = pe[:S].astype(jnp.float32)
        in_specs.append(pl.BlockSpec((TS, D), lambda b, s, ids_ref: (s, 0)))
        operands.append(pe_s)

    # gamma / beta: constant block index -> DMA'd once, resident across grid.
    in_specs += [
        pl.BlockSpec((1, D), lambda b, s, ids_ref: (0, 0)),
        pl.BlockSpec((1, D), lambda b, s, ids_ref: (0, 0)),
    ]
    operands += [gamma2, beta2]

    grid_spec = pltpu.PrefetchScalarGridSpec(
        num_scalar_prefetch=1,              # token ids -> SMEM
        grid=(B, n_s_tiles),
        in_specs=in_specs,
        out_specs=pl.BlockSpec((1, TS, D), lambda b, s, ids_ref: (b, s, 0)),
        scratch_shapes=[
            pltpu.VMEM((TS, D), tok_table.dtype),   # gathered rows
            pltpu.SemaphoreType.DMA((TS,)),         # one sem per row gather
        ],
    )

    kernel = _make_kernel(TS, if_posiemb)
    return pl.pallas_call(
        kernel,
        out_shape=jax.ShapeDtypeStruct((B, S, D), jnp.float32),
        grid_spec=grid_spec,
        compiler_params=pltpu.CompilerParams(
            # No cross-step dependency -> safe everywhere; lets v7x shard the
            # grid across its two TensorCores.
            dimension_semantics=("parallel", "parallel"),
        ),
    )(ids.astype(jnp.int32), *operands)


def _reference(ids, tok_table, pe, gamma, beta, if_posiemb=True):
    emb = jnp.take(tok_table, ids, axis=0).astype(jnp.float32)
    if if_posiemb:
        emb = emb + pe[None, : ids.shape[1]]
    mu = emb.mean(-1, keepdims=True)
    var = ((emb - mu) ** 2).mean(-1, keepdims=True)
    g = jnp.reshape(gamma, (1, 1, -1))
    b = jnp.reshape(beta, (1, 1, -1))
    return (emb - mu) / jnp.sqrt(var + LN_EPS) * g + b


if __name__ == "__main__":
    # Small config implied by the module: seq_len=S, d_model=D, vocab_size=V.
    B, S, D, V = 2, 8, 128, 64

    key = jax.random.PRNGKey(0)
    k_ids, k_tok = jax.random.split(key)

    ids = jax.random.randint(k_ids, (B, S), 0, V, dtype=jnp.int32)
    # nn.Embedding default init: N(0, 1)
    tok_table = jax.random.normal(k_tok, (V, D), dtype=jnp.float32)
    # nn.LayerNorm default init: weight=1, bias=0
    gamma = jnp.ones((1, D), dtype=jnp.float32)
    beta = jnp.zeros((1, D), dtype=jnp.float32)
    pe = make_positional_encoding(S, D)

    # if_posiemb = True path
    out = embedding_forward(ids, tok_table, pe, gamma, beta, if_posiemb=True)
    out = jax.block_until_ready(out)
    ref = _reference(ids, tok_table, pe, gamma, beta, if_posiemb=True)
    assert out.shape == (B, S, D)
    assert jnp.allclose(out, ref, atol=1e-4, rtol=1e-4), "mismatch (posiemb=True)"

    # if_posiemb = False path (pe input dropped entirely in this variant)
    out_np = embedding_forward(ids, tok_table, pe, gamma, beta, if_posiemb=False)
    out_np = jax.block_until_ready(out_np)
    ref_np = _reference(ids, tok_table, pe, gamma, beta, if_posiemb=False)
    assert jnp.allclose(out_np, ref_np, atol=1e-4, rtol=1e-4), "mismatch (posiemb=False)"

    print("KERNEL_OK")
</pallas_src>

<mosaic_0001>
module attributes {stable_mosaic.version = 11 : i64} {
  func.func @kernel(%arg0: i32, %arg1: i32, %arg2: memref<2x8xi32, #tpu.memory_space<smem>>, %arg3: memref<64x128xf32, #tpu.memory_space<any>>, %arg4: memref<8x128xf32, #tpu.memory_space<vmem>>, %arg5: memref<1x128xf32, #tpu.memory_space<vmem>>, %arg6: memref<1x128xf32, #tpu.memory_space<vmem>>, %arg7: memref<1x8x128xf32, #tpu.memory_space<vmem>>, %arg8: memref<8x128xf32, #tpu.memory_space<vmem>>, %arg9: memref<8x!tpu.dma_semaphore, #tpu.memory_space<semaphore_mem>>) attributes {dimension_semantics = [#tpu.dimension_semantics<parallel>, #tpu.dimension_semantics<parallel>], iteration_bounds = array<i64: 2, 1>, scalar_prefetch = 1 : i64, scratch_operands = 2 : i64, tpu.core_type = #tpu.core_type<tc>, window_params = [{}, {transform_indices = @transform_1, window_bounds = array<i64: 8, 128>}, {pipeline_mode = #tpu.pipeline_mode<synchronous>, transform_indices = @transform_2, window_bounds = array<i64: 1, 128>}, {pipeline_mode = #tpu.pipeline_mode<synchronous>, transform_indices = @transform_3, window_bounds = array<i64: 1, 128>}, {transform_indices = @transform_4, window_bounds = array<i64: 1, 8, 128>}]} {
    %c8_i32 = arith.constant 8 : i32
    %0 = arith.muli %arg1, %c8_i32 : i32
    %c0_i32 = arith.constant 0 : i32
    %1 = arith.addi %0, %c0_i32 : i32
    %2 = arith.index_cast %arg0 : i32 to index
    %3 = arith.index_cast %1 : i32 to index
    %4 = memref.load %arg2[%2, %3] : memref<2x8xi32, #tpu.memory_space<smem>>
    %c0_i32_0 = arith.constant 0 : i32
    %c0_i32_1 = arith.constant 0 : i32
    %c0_i32_2 = arith.constant 0 : i32
    %5 = tpu.memref_slice %arg3[%4, %c0_i32_2] : memref<64x128xf32, #tpu.memory_space<any>> -> memref<1x128xf32, #tpu.memory_space<any>>
    %6 = tpu.memref_squeeze %5 : memref<1x128xf32, #tpu.memory_space<any>> -> memref<128xf32, #tpu.memory_space<any>>
    %c0_i32_3 = arith.constant 0 : i32
    %7 = tpu.memref_slice %arg8[%c0_i32_0, %c0_i32_3] : memref<8x128xf32, #tpu.memory_space<vmem>> -> memref<1x128xf32, #tpu.memory_space<vmem>>
    %8 = tpu.memref_squeeze %7 : memref<1x128xf32, #tpu.memory_space<vmem>> -> memref<128xf32, #tpu.memory_space<vmem>>
    %9 = tpu.memref_slice %arg9[%c0_i32_1] : memref<8x!tpu.dma_semaphore, #tpu.memory_space<semaphore_mem>> -> memref<1x!tpu.dma_semaphore, #tpu.memory_space<semaphore_mem>>
    %10 = tpu.memref_squeeze %9 : memref<1x!tpu.dma_semaphore, #tpu.memory_space<semaphore_mem>> -> memref<!tpu.dma_semaphore, #tpu.memory_space<semaphore_mem>>
    tpu.enqueue_dma source(%6 : memref<128xf32, #tpu.memory_space<any>>) target(%8 : memref<128xf32, #tpu.memory_space<vmem>>) target_semaphore(%10 : memref<!tpu.dma_semaphore, #tpu.memory_space<semaphore_mem>>)
    %c1_i32 = arith.constant 1 : i32
    %11 = arith.addi %0, %c1_i32 : i32
    %12 = arith.index_cast %arg0 : i32 to index
    %13 = arith.index_cast %11 : i32 to index
    %14 = memref.load %arg2[%12, %13] : memref<2x8xi32, #tpu.memory_space<smem>>
    %c1_i32_4 = arith.constant 1 : i32
    %c1_i32_5 = arith.constant 1 : i32
    %c0_i32_6 = arith.constant 0 : i32
    %15 = tpu.memref_slice %arg3[%14, %c0_i32_6] : memref<64x128xf32, #tpu.memory_space<any>> -> memref<1x128xf32, #tpu.memory_space<any>>
    %16 = tpu.memref_squeeze %15 : memref<1x128xf32, #tpu.memory_space<any>> -> memref<128xf32, #tpu.memory_space<any>>
    %c0_i32_7 = arith.constant 0 : i32
    %17 = tpu.memref_slice %arg8[%c1_i32_4, %c0_i32_7] : memref<8x128xf32, #tpu.memory_space<vmem>> -> memref<1x128xf32, #tpu.memory_space<vmem>>
    %18 = tpu.memref_squeeze %17 : memref<1x128xf32, #tpu.memory_space<vmem>> -> memref<128xf32, #tpu.memory_space<vmem>>
    %19 = tpu.memref_slice %arg9[%c1_i32_5] : memref<8x!tpu.dma_semaphore, #tpu.memory_space<semaphore_mem>> -> memref<1x!tpu.dma_semaphore, #tpu.memory_space<semaphore_mem>>
    %20 = tpu.memref_squeeze %19 : memref<1x!tpu.dma_semaphore, #tpu.memory_space<semaphore_mem>> -> memref<!tpu.dma_semaphore, #tpu.memory_space<semaphore_mem>>
    tpu.enqueue_dma source(%16 : memref<128xf32, #tpu.memory_space<any>>) target(%18 : memref<128xf32, #tpu.memory_space<vmem>>) target_semaphore(%20 : memref<!tpu.dma_semaphore, #tpu.memory_space<semaphore_mem>>)
    %c2_i32 = arith.constant 2 : i32
    %21 = arith.addi %0, %c2_i32 : i32
    %22 = arith.index_cast %arg0 : i32 to index
    %23 = arith.index_cast %21 : i32 to index
    %24 = memref.load %arg2[%22, %23] : memref<2x8xi32, #tpu.memory_space<smem>>
    %c2_i32_8 = arith.constant 2 : i32
    %c2_i32_9 = arith.constant 2 : i32
    %c0_i32_10 = arith.constant 0 : i32
    %25 = tpu.memref_slice %arg3[%24, %c0_i32_10] : memref<64x128xf32, #tpu.memory_space<any>> -> memref<1x128xf32, #tpu.memory_space<any>>
    %26 = tpu.memref_squeeze %25 : memref<1x128xf32, #tpu.memory_space<any>> -> memref<128xf32, #tpu.memory_space<any>>
    %c0_i32_11 = arith.constant 0 : i32
    %27 = tpu.memref_slice %arg8[%c2_i32_8, %c0_i32_11] : memref<8x128xf32, #tpu.memory_space<vmem>> -> memref<1x128xf32, #tpu.memory_space<vmem>>
    %28 = tpu.memref_squeeze %27 : memref<1x128xf32, #tpu.memory_space<vmem>> -> memref<128xf32, #tpu.memory_space<vmem>>
    %29 = tpu.memref_slice %arg9[%c2_i32_9] : memref<8x!tpu.dma_semaphore, #tpu.memory_space<semaphore_mem>> -> memref<1x!tpu.dma_semaphore, #tpu.memory_space<semaphore_mem>>
    %30 = tpu.memref_squeeze %29 : memref<1x!tpu.dma_semaphore, #tpu.memory_space<semaphore_mem>> -> memref<!tpu.dma_semaphore, #tpu.memory_space<semaphore_mem>>
    tpu.enqueue_dma source(%26 : memref<128xf32, #tpu.memory_space<any>>) target(%28 : memref<128xf32, #tpu.memory_space<vmem>>) target_semaphore(%30 : memref<!tpu.dma_semaphore, #tpu.memory_space<semaphore_mem>>)
    %c3_i32 = arith.constant 3 : i32
    %31 = arith.addi %0, %c3_i32 : i32
    %32 = arith.index_cast %arg0 : i32 to index
    %33 = arith.index_cast %31 : i32 to index
    %34 = memref.load %arg2[%32, %33] : memref<2x8xi32, #tpu.memory_space<smem>>
    %c3_i32_12 = arith.constant 3 : i32
    %c3_i32_13 = arith.constant 3 : i32
    %c0_i32_14 = arith.constant 0 : i32
    %35 = tpu.memref_slice %arg3[%34, %c0_i32_14] : memref<64x128xf32, #tpu.memory_space<any>> -> memref<1x128xf32, #tpu.memory_space<any>>
    %36 = tpu.memref_squeeze %35 : memref<1x128xf32, #tpu.memory_space<any>> -> memref<128xf32, #tpu.memory_space<any>>
    %c0_i32_15 = arith.constant 0 : i32
    %37 = tpu.memref_slice %arg8[%c3_i32_12, %c0_i32_15] : memref<8x128xf32, #tpu.memory_space<vmem>> -> memref<1x128xf32, #tpu.memory_space<vmem>>
    %38 = tpu.memref_squeeze %37 : memref<1x128xf32, #tpu.memory_space<vmem>> -> memref<128xf32, #tpu.memory_space<vmem>>
    %39 = tpu.memref_slice %arg9[%c3_i32_13] : memref<8x!tpu.dma_semaphore, #tpu.memory_space<semaphore_mem>> -> memref<1x!tpu.dma_semaphore, #tpu.memory_space<semaphore_mem>>
    %40 = tpu.memref_squeeze %39 : memref<1x!tpu.dma_semaphore, #tpu.memory_space<semaphore_mem>> -> memref<!tpu.dma_semaphore, #tpu.memory_space<semaphore_mem>>
    tpu.enqueue_dma source(%36 : memref<128xf32, #tpu.memory_space<any>>) target(%38 : memref<128xf32, #tpu.memory_space<vmem>>) target_semaphore(%40 : memref<!tpu.dma_semaphore, #tpu.memory_space<semaphore_mem>>)
    %c4_i32 = arith.constant 4 : i32
    %41 = arith.addi %0, %c4_i32 : i32
    %42 = arith.index_cast %arg0 : i32 to index
    %43 = arith.index_cast %41 : i32 to index
    %44 = memref.load %arg2[%42, %43] : memref<2x8xi32, #tpu.memory_space<smem>>
    %c4_i32_16 = arith.constant 4 : i32
    %c4_i32_17 = arith.constant 4 : i32
    %c0_i32_18 = arith.constant 0 : i32
    %45 = tpu.memref_slice %arg3[%44, %c0_i32_18] : memref<64x128xf32, #tpu.memory_space<any>> -> memref<1x128xf32, #tpu.memory_space<any>>
    %46 = tpu.memref_squeeze %45 : memref<1x128xf32, #tpu.memory_space<any>> -> memref<128xf32, #tpu.memory_space<any>>
    %c0_i32_19 = arith.constant 0 : i32
    %47 = tpu.memref_slice %arg8[%c4_i32_16, %c0_i32_19] : memref<8x128xf32, #tpu.memory_space<vmem>> -> memref<1x128xf32, #tpu.memory_space<vmem>>
    %48 = tpu.memref_squeeze %47 : memref<1x128xf32, #tpu.memory_space<vmem>> -> memref<128xf32, #tpu.memory_space<vmem>>
    %49 = tpu.memref_slice %arg9[%c4_i32_17] : memref<8x!tpu.dma_semaphore, #tpu.memory_space<semaphore_mem>> -> memref<1x!tpu.dma_semaphore, #tpu.memory_space<semaphore_mem>>
    %50 = tpu.memref_squeeze %49 : memref<1x!tpu.dma_semaphore, #tpu.memory_space<semaphore_mem>> -> memref<!tpu.dma_semaphore, #tpu.memory_space<semaphore_mem>>
    tpu.enqueue_dma source(%46 : memref<128xf32, #tpu.memory_space<any>>) target(%48 : memref<128xf32, #tpu.memory_space<vmem>>) target_semaphore(%50 : memref<!tpu.dma_semaphore, #tpu.memory_space<semaphore_mem>>)
    %c5_i32 = arith.constant 5 : i32
    %51 = arith.addi %0, %c5_i32 : i32
    %52 = arith.index_cast %arg0 : i32 to index
    %53 = arith.index_cast %51 : i32 to index
    %54 = memref.load %arg2[%52, %53] : memref<2x8xi32, #tpu.memory_space<smem>>
    %c5_i32_20 = arith.constant 5 : i32
    %c5_i32_21 = arith.constant 5 : i32
    %c0_i32_22 = arith.constant 0 : i32
    %55 = tpu.memref_slice %arg3[%54, %c0_i32_22] : memref<64x128xf32, #tpu.memory_space<any>> -> memref<1x128xf32, #tpu.memory_space<any>>
    %56 = tpu.memref_squeeze %55 : memref<1x128xf32, #tpu.memory_space<any>> -> memref<128xf32, #tpu.memory_space<any>>
    %c0_i32_23 = arith.constant 0 : i32
    %57 = tpu.memref_slice %arg8[%c5_i32_20, %c0_i32_23] : memref<8x128xf32, #tpu.memory_space<vmem>> -> memref<1x128xf32, #tpu.memory_space<vmem>>
    %58 = tpu.memref_squeeze %57 : memref<1x128xf32, #tpu.memory_space<vmem>> -> memref<128xf32, #tpu.memory_space<vmem>>
    %59 = tpu.memref_slice %arg9[%c5_i32_21] : memref<8x!tpu.dma_semaphore, #tpu.memory_space<semaphore_mem>> -> memref<1x!tpu.dma_semaphore, #tpu.memory_space<semaphore_mem>>
    %60 = tpu.memref_squeeze %59 : memref<1x!tpu.dma_semaphore, #tpu.memory_space<semaphore_mem>> -> memref<!tpu.dma_semaphore, #tpu.memory_space<semaphore_mem>>
    tpu.enqueue_dma source(%56 : memref<128xf32, #tpu.memory_space<any>>) target(%58 : memref<128xf32, #tpu.memory_space<vmem>>) target_semaphore(%60 : memref<!tpu.dma_semaphore, #tpu.memory_space<semaphore_mem>>)
    %c6_i32 = arith.constant 6 : i32
    %61 = arith.addi %0, %c6_i32 : i32
    %62 = arith.index_cast %arg0 : i32 to index
    %63 = arith.index_cast %61 : i32 to index
    %64 = memref.load %arg2[%62, %63] : memref<2x8xi32, #tpu.memory_space<smem>>
    %c6_i32_24 = arith.constant 6 : i32
    %c6_i32_25 = arith.constant 6 : i32
    %c0_i32_26 = arith.constant 0 : i32
    %65 = tpu.memref_slice %arg3[%64, %c0_i32_26] : memref<64x128xf32, #tpu.memory_space<any>> -> memref<1x128xf32, #tpu.memory_space<any>>
    %66 = tpu.memref_squeeze %65 : memref<1x128xf32, #tpu.memory_space<any>> -> memref<128xf32, #tpu.memory_space<any>>
    %c0_i32_27 = arith.constant 0 : i32
    %67 = tpu.memref_slice %arg8[%c6_i32_24, %c0_i32_27] : memref<8x128xf32, #tpu.memory_space<vmem>> -> memref<1x128xf32, #tpu.memory_space<vmem>>
    %68 = tpu.memref_squeeze %67 : memref<1x128xf32, #tpu.memory_space<vmem>> -> memref<128xf32, #tpu.memory_space<vmem>>
    %69 = tpu.memref_slice %arg9[%c6_i32_25] : memref<8x!tpu.dma_semaphore, #tpu.memory_space<semaphore_mem>> -> memref<1x!tpu.dma_semaphore, #tpu.memory_space<semaphore_mem>>
    %70 = tpu.memref_squeeze %69 : memref<1x!tpu.dma_semaphore, #tpu.memory_space<semaphore_mem>> -> memref<!tpu.dma_semaphore, #tpu.memory_space<semaphore_mem>>
    tpu.enqueue_dma source(%66 : memref<128xf32, #tpu.memory_space<any>>) target(%68 : memref<128xf32, #tpu.memory_space<vmem>>) target_semaphore(%70 : memref<!tpu.dma_semaphore, #tpu.memory_space<semaphore_mem>>)
    %c7_i32 = arith.constant 7 : i32
    %71 = arith.addi %0, %c7_i32 : i32
    %72 = arith.index_cast %arg0 : i32 to index
    %73 = arith.index_cast %71 : i32 to index
    %74 = memref.load %arg2[%72, %73] : memref<2x8xi32, #tpu.memory_space<smem>>
    %c7_i32_28 = arith.constant 7 : i32
    %c7_i32_29 = arith.constant 7 : i32
    %c0_i32_30 = arith.constant 0 : i32
    %75 = tpu.memref_slice %arg3[%74, %c0_i32_30] : memref<64x128xf32, #tpu.memory_space<any>> -> memref<1x128xf32, #tpu.memory_space<any>>
    %76 = tpu.memref_squeeze %75 : memref<1x128xf32, #tpu.memory_space<any>> -> memref<128xf32, #tpu.memory_space<any>>
    %c0_i32_31 = arith.constant 0 : i32
    %77 = tpu.memref_slice %arg8[%c7_i32_28, %c0_i32_31] : memref<8x128xf32, #tpu.memory_space<vmem>> -> memref<1x128xf32, #tpu.memory_space<vmem>>
    %78 = tpu.memref_squeeze %77 : memref<1x128xf32, #tpu.memory_space<vmem>> -> memref<128xf32, #tpu.memory_space<vmem>>
    %79 = tpu.memref_slice %arg9[%c7_i32_29] : memref<8x!tpu.dma_semaphore, #tpu.memory_space<semaphore_mem>> -> memref<1x!tpu.dma_semaphore, #tpu.memory_space<semaphore_mem>>
    %80 = tpu.memref_squeeze %79 : memref<1x!tpu.dma_semaphore, #tpu.memory_space<semaphore_mem>> -> memref<!tpu.dma_semaphore, #tpu.memory_space<semaphore_mem>>
    tpu.enqueue_dma source(%76 : memref<128xf32, #tpu.memory_space<any>>) target(%78 : memref<128xf32, #tpu.memory_space<vmem>>) target_semaphore(%80 : memref<!tpu.dma_semaphore, #tpu.memory_space<semaphore_mem>>)
    %c0_i32_32 = arith.constant 0 : i32
    %c0_i32_33 = arith.constant 0 : i32
    %c0_i32_34 = arith.constant 0 : i32
    %c0_i32_35 = arith.constant 0 : i32
    %81 = tpu.memref_slice %arg3[%c0_i32_32, %c0_i32_35] : memref<64x128xf32, #tpu.memory_space<any>> -> memref<1x128xf32, #tpu.memory_space<any>>
    %82 = tpu.memref_squeeze %81 : memref<1x128xf32, #tpu.memory_space<any>> -> memref<128xf32, #tpu.memory_space<any>>
    %c0_i32_36 = arith.constant 0 : i32
    %83 = tpu.memref_slice %arg8[%c0_i32_33, %c0_i32_36] : memref<8x128xf32, #tpu.memory_space<vmem>> -> memref<1x128xf32, #tpu.memory_space<vmem>>
    %84 = tpu.memref_squeeze %83 : memref<1x128xf32, #tpu.memory_space<vmem>> -> memref<128xf32, #tpu.memory_space<vmem>>
    %85 = tpu.memref_slice %arg9[%c0_i32_34] : memref<8x!tpu.dma_semaphore, #tpu.memory_space<semaphore_mem>> -> memref<1x!tpu.dma_semaphore, #tpu.memory_space<semaphore_mem>>
    %86 = tpu.memref_squeeze %85 : memref<1x!tpu.dma_semaphore, #tpu.memory_space<semaphore_mem>> -> memref<!tpu.dma_semaphore, #tpu.memory_space<semaphore_mem>>
    tpu.wait_dma2 semaphore(%86 : memref<!tpu.dma_semaphore, #tpu.memory_space<semaphore_mem>>) src(%82 : memref<128xf32, #tpu.memory_space<any>>) dst(%84 : memref<128xf32, #tpu.memory_space<vmem>>)
    %c0_i32_37 = arith.constant 0 : i32
    %c1_i32_38 = arith.constant 1 : i32
    %c1_i32_39 = arith.constant 1 : i32
    %c0_i32_40 = arith.constant 0 : i32
    %87 = tpu.memref_slice %arg3[%c0_i32_37, %c0_i32_40] : memref<64x128xf32, #tpu.memory_space<any>> -> memref<1x128xf32, #tpu.memory_space<any>>
    %88 = tpu.memref_squeeze %87 : memref<1x128xf32, #tpu.memory_space<any>> -> memref<128xf32, #tpu.memory_space<any>>
    %c0_i32_41 = arith.constant 0 : i32
    %89 = tpu.memref_slice %arg8[%c1_i32_38, %c0_i32_41] : memref<8x128xf32, #tpu.memory_space<vmem>> -> memref<1x128xf32, #tpu.memory_space<vmem>>
    %90 = tpu.memref_squeeze %89 : memref<1x128xf32, #tpu.memory_space<vmem>> -> memref<128xf32, #tpu.memory_space<vmem>>
    %91 = tpu.memref_slice %arg9[%c1_i32_39] : memref<8x!tpu.dma_semaphore, #tpu.memory_space<semaphore_mem>> -> memref<1x!tpu.dma_semaphore, #tpu.memory_space<semaphore_mem>>
    %92 = tpu.memref_squeeze %91 : memref<1x!tpu.dma_semaphore, #tpu.memory_space<semaphore_mem>> -> memref<!tpu.dma_semaphore, #tpu.memory_space<semaphore_mem>>
    tpu.wait_dma2 semaphore(%92 : memref<!tpu.dma_semaphore, #tpu.memory_space<semaphore_mem>>) src(%88 : memref<128xf32, #tpu.memory_space<any>>) dst(%90 : memref<128xf32, #tpu.memory_space<vmem>>)
    %c0_i32_42 = arith.constant 0 : i32
    %c2_i32_43 = arith.constant 2 : i32
    %c2_i32_44 = arith.constant 2 : i32
    %c0_i32_45 = arith.constant 0 : i32
    %93 = tpu.memref_slice %arg3[%c0_i32_42, %c0_i32_45] : memref<64x128xf32, #tpu.memory_space<any>> -> memref<1x128xf32, #tpu.memory_space<any>>
    %94 = tpu.memref_squeeze %93 : memref<1x128xf32, #tpu.memory_space<any>> -> memref<128xf32, #tpu.memory_space<any>>
    %c0_i32_46 = arith.constant 0 : i32
    %95 = tpu.memref_slice %arg8[%c2_i32_43, %c0_i32_46] : memref<8x128xf32, #tpu.memory_space<vmem>> -> memref<1x128xf32, #tpu.memory_space<vmem>>
    %96 = tpu.memref_squeeze %95 : memref<1x128xf32, #tpu.memory_space<vmem>> -> memref<128xf32, #tpu.memory_space<vmem>>
    %97 = tpu.memref_slice %arg9[%c2_i32_44] : memref<8x!tpu.dma_semaphore, #tpu.memory_space<semaphore_mem>> -> memref<1x!tpu.dma_semaphore, #tpu.memory_space<semaphore_mem>>
    %98 = tpu.memref_squeeze %97 : memref<1x!tpu.dma_semaphore, #tpu.memory_space<semaphore_mem>> -> memref<!tpu.dma_semaphore, #tpu.memory_space<semaphore_mem>>
    tpu.wait_dma2 semaphore(%98 : memref<!tpu.dma_semaphore, #tpu.memory_space<semaphore_mem>>) src(%94 : memref<128xf32, #tpu.memory_space<any>>) dst(%96 : memref<128xf32, #tpu.memory_space<vmem>>)
    %c0_i32_47 = arith.constant 0 : i32
    %c3_i32_48 = arith.constant 3 : i32
    %c3_i32_49 = arith.constant 3 : i32
    %c0_i32_50 = arith.constant 0 : i32
    %99 = tpu.memref_slice %arg3[%c0_i32_47, %c0_i32_50] : memref<64x128xf32, #tpu.memory_space<any>> -> memref<1x128xf32, #tpu.memory_space<any>>
    %100 = tpu.memref_squeeze %99 : memref<1x128xf32, #tpu.memory_space<any>> -> memref<128xf32, #tpu.memory_space<any>>
    %c0_i32_51 = arith.constant 0 : i32
    %101 = tpu.memref_slice %arg8[%c3_i32_48, %c0_i32_51] : memref<8x128xf32, #tpu.memory_space<vmem>> -> memref<1x128xf32, #tpu.memory_space<vmem>>
    %102 = tpu.memref_squeeze %101 : memref<1x128xf32, #tpu.memory_space<vmem>> -> memref<128xf32, #tpu.memory_space<vmem>>
    %103 = tpu.memref_slice %arg9[%c3_i32_49] : memref<8x!tpu.dma_semaphore, #tpu.memory_space<semaphore_mem>> -> memref<1x!tpu.dma_semaphore, #tpu.memory_space<semaphore_mem>>
    %104 = tpu.memref_squeeze %103 : memref<1x!tpu.dma_semaphore, #tpu.memory_space<semaphore_mem>> -> memref<!tpu.dma_semaphore, #tpu.memory_space<semaphore_mem>>
    tpu.wait_dma2 semaphore(%104 : memref<!tpu.dma_semaphore, #tpu.memory_space<semaphore_mem>>) src(%100 : memref<128xf32, #tpu.memory_space<any>>) dst(%102 : memref<128xf32, #tpu.memory_space<vmem>>)
    %c0_i32_52 = arith.constant 0 : i32
    %c4_i32_53 = arith.constant 4 : i32
    %c4_i32_54 = arith.constant 4 : i32
    %c0_i32_55 = arith.constant 0 : i32
    %105 = tpu.memref_slice %arg3[%c0_i32_52, %c0_i32_55] : memref<64x128xf32, #tpu.memory_space<any>> -> memref<1x128xf32, #tpu.memory_space<any>>
    %106 = tpu.memref_squeeze %105 : memref<1x128xf32, #tpu.memory_space<any>> -> memref<128xf32, #tpu.memory_space<any>>
    %c0_i32_56 = arith.constant 0 : i32
    %107 = tpu.memref_slice %arg8[%c4_i32_53, %c0_i32_56] : memref<8x128xf32, #tpu.memory_space<vmem>> -> memref<1x128xf32, #tpu.memory_space<vmem>>
    %108 = tpu.memref_squeeze %107 : memref<1x128xf32, #tpu.memory_space<vmem>> -> memref<128xf32, #tpu.memory_space<vmem>>
    %109 = tpu.memref_slice %arg9[%c4_i32_54] : memref<8x!tpu.dma_semaphore, #tpu.memory_space<semaphore_mem>> -> memref<1x!tpu.dma_semaphore, #tpu.memory_space<semaphore_mem>>
    %110 = tpu.memref_squeeze %109 : memref<1x!tpu.dma_semaphore, #tpu.memory_space<semaphore_mem>> -> memref<!tpu.dma_semaphore, #tpu.memory_space<semaphore_mem>>
    tpu.wait_dma2 semaphore(%110 : memref<!tpu.dma_semaphore, #tpu.memory_space<semaphore_mem>>) src(%106 : memref<128xf32, #tpu.memory_space<any>>) dst(%108 : memref<128xf32, #tpu.memory_space<vmem>>)
    %c0_i32_57 = arith.constant 0 : i32
    %c5_i32_58 = arith.constant 5 : i32
    %c5_i32_59 = arith.constant 5 : i32
    %c0_i32_60 = arith.constant 0 : i32
    %111 = tpu.memref_slice %arg3[%c0_i32_57, %c0_i32_60] : memref<64x128xf32, #tpu.memory_space<any>> -> memref<1x128xf32, #tpu.memory_space<any>>
    %112 = tpu.memref_squeeze %111 : memref<1x128xf32, #tpu.memory_space<any>> -> memref<128xf32, #tpu.memory_space<any>>
    %c0_i32_61 = arith.constant 0 : i32
    %113 = tpu.memref_slice %arg8[%c5_i32_58, %c0_i32_61] : memref<8x128xf32, #tpu.memory_space<vmem>> -> memref<1x128xf32, #tpu.memory_space<vmem>>
    %114 = tpu.memref_squeeze %113 : memref<1x128xf32, #tpu.memory_space<vmem>> -> memref<128xf32, #tpu.memory_space<vmem>>
    %115 = tpu.memref_slice %arg9[%c5_i32_59] : memref<8x!tpu.dma_semaphore, #tpu.memory_space<semaphore_mem>> -> memref<1x!tpu.dma_semaphore, #tpu.memory_space<semaphore_mem>>
    %116 = tpu.memref_squeeze %115 : memref<1x!tpu.dma_semaphore, #tpu.memory_space<semaphore_mem>> -> memref<!tpu.dma_semaphore, #tpu.memory_space<semaphore_mem>>
    tpu.wait_dma2 semaphore(%116 : memref<!tpu.dma_semaphore, #tpu.memory_space<semaphore_mem>>) src(%112 : memref<128xf32, #tpu.memory_space<any>>) dst(%114 : memref<128xf32, #tpu.memory_space<vmem>>)
    %c0_i32_62 = arith.constant 0 : i32
    %c6_i32_63 = arith.constant 6 : i32
    %c6_i32_64 = arith.constant 6 : i32
    %c0_i32_65 = arith.constant 0 : i32
    %117 = tpu.memref_slice %arg3[%c0_i32_62, %c0_i32_65] : memref<64x128xf32, #tpu.memory_space<any>> -> memref<1x128xf32, #tpu.memory_space<any>>
    %118 = tpu.memref_squeeze %117 : memref<1x128xf32, #tpu.memory_space<any>> -> memref<128xf32, #tpu.memory_space<any>>
    %c0_i32_66 = arith.constant 0 : i32
    %119 = tpu.memref_slice %arg8[%c6_i32_63, %c0_i32_66] : memref<8x128xf32, #tpu.memory_space<vmem>> -> memref<1x128xf32, #tpu.memory_space<vmem>>
    %120 = tpu.memref_squeeze %119 : memref<1x128xf32, #tpu.memory_space<vmem>> -> memref<128xf32, #tpu.memory_space<vmem>>
    %121 = tpu.memref_slice %arg9[%c6_i32_64] : memref<8x!tpu.dma_semaphore, #tpu.memory_space<semaphore_mem>> -> memref<1x!tpu.dma_semaphore, #tpu.memory_space<semaphore_mem>>
    %122 = tpu.memref_squeeze %121 : memref<1x!tpu.dma_semaphore, #tpu.memory_space<semaphore_mem>> -> memref<!tpu.dma_semaphore, #tpu.memory_space<semaphore_mem>>
    tpu.wait_dma2 semaphore(%122 : memref<!tpu.dma_semaphore, #tpu.memory_space<semaphore_mem>>) src(%118 : memref<128xf32, #tpu.memory_space<any>>) dst(%120 : memref<128xf32, #tpu.memory_space<vmem>>)
    %c0_i32_67 = arith.constant 0 : i32
    %c7_i32_68 = arith.constant 7 : i32
    %c7_i32_69 = arith.constant 7 : i32
    %c0_i32_70 = arith.constant 0 : i32
    %123 = tpu.memref_slice %arg3[%c0_i32_67, %c0_i32_70] : memref<64x128xf32, #tpu.memory_space<any>> -> memref<1x128xf32, #tpu.memory_space<any>>
    %124 = tpu.memref_squeeze %123 : memref<1x128xf32, #tpu.memory_space<any>> -> memref<128xf32, #tpu.memory_space<any>>
    %c0_i32_71 = arith.constant 0 : i32
    %125 = tpu.memref_slice %arg8[%c7_i32_68, %c0_i32_71] : memref<8x128xf32, #tpu.memory_space<vmem>> -> memref<1x128xf32, #tpu.memory_space<vmem>>
    %126 = tpu.memref_squeeze %125 : memref<1x128xf32, #tpu.memory_space<vmem>> -> memref<128xf32, #tpu.memory_space<vmem>>
    %127 = tpu.memref_slice %arg9[%c7_i32_69] : memref<8x!tpu.dma_semaphore, #tpu.memory_space<semaphore_mem>> -> memref<1x!tpu.dma_semaphore, #tpu.memory_space<semaphore_mem>>
    %128 = tpu.memref_squeeze %127 : memref<1x!tpu.dma_semaphore, #tpu.memory_space<semaphore_mem>> -> memref<!tpu.dma_semaphore, #tpu.memory_space<semaphore_mem>>
    tpu.wait_dma2 semaphore(%128 : memref<!tpu.dma_semaphore, #tpu.memory_space<semaphore_mem>>) src(%124 : memref<128xf32, #tpu.memory_space<any>>) dst(%126 : memref<128xf32, #tpu.memory_space<vmem>>)
    %c0 = arith.constant 0 : index
    %c0_72 = arith.constant 0 : index
    %129 = vector.load %arg8[%c0, %c0_72] : memref<8x128xf32, #tpu.memory_space<vmem>>, vector<8x128xf32>
    %c0_73 = arith.constant 0 : index
    %c0_74 = arith.constant 0 : index
    %130 = vector.load %arg4[%c0_73, %c0_74] : memref<8x128xf32, #tpu.memory_space<vmem>>, vector<8x128xf32>
    %131 = arith.addf %129, %130 : vector<8x128xf32>
    %c0_75 = arith.constant 0 : index
    %c0_76 = arith.constant 0 : index
    %132 = vector.load %arg5[%c0_75, %c0_76] : memref<1x128xf32, #tpu.memory_space<vmem>>, vector<1x128xf32>
    %c0_77 = arith.constant 0 : index
    %c0_78 = arith.constant 0 : index
    %133 = vector.load %arg6[%c0_77, %c0_78] : memref<1x128xf32, #tpu.memory_space<vmem>>, vector<1x128xf32>
    %cst = arith.constant dense<0.000000e+00> : vector<8xf32>
    %134 = vector.multi_reduction <add>, %131, %cst [1] : vector<8x128xf32> to vector<8xf32>
    %135 = vector.shape_cast %134 : vector<8xf32> to vector<8x1xf32>
    %cst_79 = arith.constant 1.280000e+02 : f32
    %136 = vector.broadcast %cst_79 : f32 to vector<8x1xf32>
    %137 = arith.divf %135, %136 : vector<8x1xf32>
    %138 = arith.mulf %131, %131 : vector<8x128xf32>
    %cst_80 = arith.constant dense<0.000000e+00> : vector<8xf32>
    %139 = vector.multi_reduction <add>, %138, %cst_80 [1] : vector<8x128xf32> to vector<8xf32>
    %140 = vector.shape_cast %139 : vector<8xf32> to vector<8x1xf32>
    %cst_81 = arith.constant 1.280000e+02 : f32
    %141 = vector.broadcast %cst_81 : f32 to vector<8x1xf32>
    %142 = arith.divf %140, %141 : vector<8x1xf32>
    %143 = arith.mulf %137, %137 : vector<8x1xf32>
    %144 = arith.subf %142, %143 : vector<8x1xf32>
    %cst_82 = arith.constant 0.000000e+00 : f32
    %145 = vector.broadcast %cst_82 : f32 to vector<8x1xf32>
    %146 = arith.maximumf %144, %145 : vector<8x1xf32>
    %147 = vector.broadcast %137 : vector<8x1xf32> to vector<8x128xf32>
    %148 = arith.subf %131, %147 : vector<8x128xf32>
    %cst_83 = arith.constant 9.99999974E-6 : f32
    %149 = vector.broadcast %cst_83 : f32 to vector<8x1xf32>
    %150 = arith.addf %146, %149 : vector<8x1xf32>
    %151 = math.rsqrt %150 : vector<8x1xf32>
    %152 = vector.broadcast %151 : vector<8x1xf32> to vector<8x128xf32>
    %153 = arith.mulf %148, %152 : vector<8x128xf32>
    %154 = vector.broadcast %132 : vector<1x128xf32> to vector<8x128xf32>
    %155 = arith.mulf %153, %154 : vector<8x128xf32>
    %156 = vector.broadcast %133 : vector<1x128xf32> to vector<8x128xf32>
    %157 = arith.addf %155, %156 : vector<8x128xf32>
    %158 = vector.shape_cast %157 : vector<8x128xf32> to vector<1x8x128xf32>
    %c0_84 = arith.constant 0 : index
    %c0_85 = arith.constant 0 : index
    %c0_86 = arith.constant 0 : index
    %159 = vector.load %arg7[%c0_84, %c0_85, %c0_86] : memref<1x8x128xf32, #tpu.memory_space<vmem>>, vector<1x8x128xf32>
    tpu.vector_store %arg7[%c0_84, %c0_85, %c0_86], %158 {strides = array<i32>} : memref<1x8x128xf32, #tpu.memory_space<vmem>>, vector<1x8x128xf32>,
    return
  }
  func.func @transform_1(%arg0: i32, %arg1: i32, %arg2: memref<2x8xi32, #tpu.memory_space<smem>>) -> (i32, i32) {
    %c0_i32 = arith.constant 0 : i32
    %c0_i32_0 = arith.constant 0 : i32
    return %arg1, %c0_i32 : i32, i32
  }
  func.func @transform_2(%arg0: i32, %arg1: i32, %arg2: memref<2x8xi32, #tpu.memory_space<smem>>) -> (i32, i32) {
    %c0_i32 = arith.constant 0 : i32
    %c0_i32_0 = arith.constant 0 : i32
    %c0_i32_1 = arith.constant 0 : i32
    return %c0_i32, %c0_i32_0 : i32, i32
  }
  func.func @transform_3(%arg0: i32, %arg1: i32, %arg2: memref<2x8xi32, #tpu.memory_space<smem>>) -> (i32, i32) {
    %c0_i32 = arith.constant 0 : i32
    %c0_i32_0 = arith.constant 0 : i32
    %c0_i32_1 = arith.constant 0 : i32
    return %c0_i32, %c0_i32_0 : i32, i32
  }
  func.func @transform_4(%arg0: i32, %arg1: i32, %arg2: memref<2x8xi32, #tpu.memory_space<smem>>) -> (i32, i32, i32) {
    %c0_i32 = arith.constant 0 : i32
    %c0_i32_0 = arith.constant 0 : i32
    return %arg0, %arg1, %c0_i32 : i32, i32, i32
  }
}

</mosaic_0001>

<bundles_post_ra>
// kernel: tpu_custom_call.1
= control target key start
LH: loop header
LB: loop body
LE: loop exit
PB: predicated region body
PF: predicated region fallthrough
CT: control target
= control target key end

     0   :  { %s1374_s0 = inlined_call_operand.hbm [shape: s32[2,8], index: 0, kind: input, shape index: {}]   ;;  %s1375_s1 = inlined_call_operand.hbm [shape: f32[64,128], index: 1, kind: input, shape index: {}]   ;;  %s1376_s2 = inlined_call_operand.hbm [shape: f32[8,128], index: 2, kind: input, shape index: {}]   ;;  %s1377_s3 = inlined_call_operand.vmem [shape: f32[1,128], index: 3, kind: input, shape index: {}]   ;;  %s1378_s4 = inlined_call_operand.vmem [shape: f32[1,128], index: 4, kind: input, shape index: {}]   ;;  %s1379_s5 = inlined_call_operand.hbm [shape: f32[2,8,128], index: 5, kind: output, shape index: {}]  }
   0x1   :  { %1387 = sst [smem:[#allocation42_spill]] %s1376_s2  ;;  %s700_s20 = scalar_lea.hbm %s1374_s0, 32 }
   0x2   :  { %p701_p0 = scmp.ne.s32.totalorder %s1374_s0, %s700_s20  ;;  %p704_p1 = scmp.lt.u32.totalorder %s700_s20, %s1374_s0 }
   0x4   :  { %p706_p2 = pnand %p704_p1, %p701_p0 }
   0x6   :  { %709 = shalt.err (!%p706_p2)  }
   0x7   :  { %s1032_s25 = smov [#allocation5]  }
   0x8   :  { %11 = dma.hbm_to_smem %s1374_s0, 32, %s1032_s25, [#allocation4] }
   0x9   :  { %982 = dma.done.wait [#allocation4], 32 }
   0xa   :  { %983 = vsyncadd [#allocation4], 4294967264 }
   0xb   :  { %13 = sfence }
   0xc   :  { %14 = vsyncpa [#allocation7], 0 }
   0xd   :  { %15 = vsyncpa [#allocation8], 0 }
   0xe   :  { %17 = vsyncpa [#allocation8 + $0x1], 0  ;;  %s1085_s28 = smov 0   ;;  %s1087_s29 = smov 0  }
   0xf   :  { %s1089_s30 = smov 0   ;;  %s1091_s6 = smov 0  }
  0x10   :  { %s1093_s7 = smov 0   ;;  %s1095_s8 = smov 0  }
  0x11 LB: > { %1388 = sst [smem:[#allocation39_spill]] %s1026_s7  ;;  %s586_s0 = sadd.s32 4294967295, %s1030_s8   ;;  %s1030_s8 = sphi %s1095_s8, %s23_s8   ;;  %s1026_s7 = sphi %s1093_s7, %s1404_s7   ;;  %s1022_s6 = sphi %s1091_s6, %s1403_s6   ;;  %s1018_s30 = sphi %s1089_s30, %s1407_s30   ;;  %s1014_s29 = sphi %s1087_s29, %s1406_s29   ;;  %s1010_s28 = sphi %s1085_s28, %s1405_s28  }
  0x12   : > { %s587_s9 = sadd.s32 4294967294, %s1030_s8   ;;  %s35_s10 = sadd.s32 1, %s1026_s7 }
  0x13   : > { %s112_s11 = sadd.s32 1, %s1018_s30  ;;  %p37_p3 = scmp.ge.s32.totalorder %s35_s10, 2 }
  0x14   : > { %p122_p4 = scmp.ne.s32.totalorder %s1018_s30, %s1014_s29  ;;  %p123_p5 = scmp.eq.s32.totalorder %s586_s0, 1 }
  0x15   : > { %p128_p6 = scmp.ne.s32.totalorder %s1014_s29, %s1010_s28  ;;  %s1409_s10 = smov (%p37_p3, %s35_s10), 0 }
  0x16   : > { %1389 = sst [smem:[#allocation40_spill]] %s1409_s10  ;;  %p1125_p7 = por %p123_p5, %p122_p4 }
  0x17   : > { %p129_p8 = scmp.eq.s32.totalorder %s587_s9, 1  ;;  %s107_s13 = ssub.s32 %s1026_s7, %s1409_s10 }
  0x18   : > { %s1390_s12 = scalar_select %p1125_p7, 1, 0 }
  0x19   : > { %p588_p9 = scmp.ge.s32.totalorder %s1030_s8, 1  ;;  %p110_p10 = scmp.eq.s32.totalorder %s107_s13, 0 }
  0x1a   : > { %p1132_p11 = por %p129_p8, %p128_p6  ;;  %p136_p12 = scmp.lt.s32.totalorder %s1030_s8, 3 }
  0x1b   : > { %s1138_s15 = scalar_select %p110_p10, %s1018_s30, %s112_s11  }
  0x1c   : > { %s1391_s14 = scalar_select %p1132_p11, 1, 0 }
  0x1d   : > { %1392 = sst [smem:[#allocation41_spill]] %s1138_s15  ;;  %p1140_p13 = pnand %p588_p9, %p136_p12 }
  0x1e   : > { %p1144_p0 = scmp.eq.s32.totalorder %s586_s0, 0  ;;  %s1033_s18 = smov [#allocation6]  }
  0x1f   : > { %s1393_s16 = scalar_select %p1140_p13, 1, 0 }
  0x20   : > { %s1394_s17 = scalar_select %p1144_p0, 1, 0 }
  0x21   : > { %p629_p1 = pneg %p1140_p13  ;;  %s151_s19 = sshll.u32 %s1033_s18, 4  ;;  %s152_s19 = int_to_ptr.vmem [resolvable:$true] %s151_s19 }
  0x22   : > { %s1396_s2 = sld [smem:[#allocation42_spill]] }
  0x23   : > { %p1152_p2 = pnand %p1144_p0, %p629_p1 }
  0x25   : > { %p712_p4 = pneg %p1152_p2 }
  0x28   : > { %s710_s23 = scalar_lea.hbm %s1396_s2, 128 }
  0x29   : > { %p711_p3 = scmp.ne.s32.totalorder %s1396_s2, %s710_s23  ;;  %p717_p8 = scmp.lt.u32.totalorder %s710_s23, %s1396_s2 }
  0x2b   : > { %p713_p5 = pnand %p712_p4, %p711_p3 }
  0x2d   : > { %p714_p6 = pneg %p713_p5 }
  0x2f   : > { %p719_p9 = pnand %p717_p8, %p714_p6 }
  0x31   : > { %722 = shalt.err (!%p719_p9)
}
  0x32   : > { %s723_s0 = scalar_lea.vmem %s152_s19, 128  ;;  %p731_p11 = scmp.lt.s32.totalorder %s152_s19, %s152_s19 }
  0x33   : > { %p724_p10 = scmp.ne.s32.totalorder %s152_s19, %s723_s0  ;;  %p732_p7 = scmp.lt.s32.totalorder %s723_s0, %s723_s0 }
  0x35   : > { %p726_p12 = pnand %p724_p10, %p712_p4  ;;  %p733_p0 = por %p732_p7, %p731_p11 }
  0x37   : > { %p727_p1 = pneg %p726_p12 }
  0x39   : > { %p734_p13 = pnand %p733_p0, %p727_p1 }
  0x3b   : > { %737 = shalt.err (!%p734_p13)
}
  0x3c   : > { %632 = dma.hbm_to_vmem [thread:$0]  (!%p1152_p2), %s1396_s2, 128, %s152_s19, [#allocation7]  }
  0x3d   : > { %p1397_p3 = scmp.ne.s32.totalorder %s1393_s16, 0 }
  0x3e   : > { %p1398_p5 = scmp.ne.s32.totalorder (!%p1397_p3), %s1394_s17, 0 }
  0x3f   : > { %170 = sbr.rel (%p1397_p3) target bundleno = 456 (0x1c8), region = 32 }
  0x46   : > { %985 = dma.done.wait (%p1398_p5), [#allocation7], 128  }
  0x47   : > { %987 = vsyncadd (%p1398_p5), [#allocation7], 4294967168  ;;  %s1384_s13 = sand.u32 1, %s1014_s29   ;;  %s1180_s18 = sshll.u32 %s1022_s6, 7 }
  0x48   : > { %s1184_s19 = sshll.u32 %s1384_s13, 3  ;;  %s197_s16 = sld [smem:[#allocation5 + %s1180_s18]] }
  0x49   : > { %s1034_s20 = smov [#allocation2]   ;;  %s218_s22 = sadd.s32 1, %s1180_s18 }
  0x4a   : > { %s207_s21 = sshll.u32 %s1034_s20, 4  ;;  %s1190_s17 = sld [smem:[#allocation5 + %s218_s22]]  ;;  %s1188_s21 = int_to_ptr.vmem [resolvable:$true] %s207_s21 }
  0x4b   : > { %s242_s23 = sadd.s32 2, %s1180_s18  ;;  %s1035_s24 = smov [#allocation2 + $0x1]  }
  0x4c   : > { %s231_s25 = sshll.u32 %s1035_s24, 4  ;;  %s1193_s26 = sld [smem:[#allocation5 + %s242_s23]]  ;;  %s1195_s25 = int_to_ptr.vmem [resolvable:$true] %s231_s25 }
  0x4d   : > { %s1203_s2 = scalar_lea.hbm %s1375_s1, 1024 }
  0x4e   : > { %s594_s6 = sshll.u32 %s197_s16, 4 }
  0x4f   : > { %s199_s9 = scalar_lea.hbm %s1375_s1, %s594_s6 }
  0x50   : > { %s738_s11 = scalar_lea.hbm %s199_s9, 16  ;;  %p741_p11 = scmp.lt.u32.totalorder %s199_s9, %s1375_s1 }
  0x51   : > { %p739_p7 = scmp.ne.s32.totalorder %s199_s9, %s738_s11  ;;  %p742_p13 = scmp.lt.u32.totalorder %s1203_s2, %s738_s11 }
  0x52   : > { %p744_p2 = scmp.lt.u32.totalorder %s738_s11, %s199_s9 }
  0x53   : > { %p743_p0 = por %p742_p13, %p741_p11 }
  0x55   : > { %p745_p4 = por %p744_p2, %p743_p0 }
  0x57   : > { %p746_p6 = pnand %p745_p4, %p739_p7 }
  0x59   : > { %749 = shalt.err (!%p746_p6)  }
  0x5a   : > { %s750_s16 = scalar_lea.vmem %s1188_s21, 16  ;;  %s1212_s13 = scalar_lea.vmem %s1188_s21, 128 }
  0x5b   : > { %p751_p8 = scmp.ne.s32.totalorder %s1188_s21, %s750_s16  ;;  %p755_p9 = scmp.lt.s32.totalorder %s1188_s21, %s1188_s21 }
  0x5c   : > { %p756_p10 = scmp.lt.s32.totalorder %s1212_s13, %s750_s16 }
  0x5e   : > { %p757_p12 = por %p756_p10, %p755_p9 }
  0x60   : > { %p758_p1 = pnand %p757_p12, %p751_p8 }
  0x62   : > { %761 = shalt.err (!%p758_p1)  }
  0x63   : > { %210 = dma.hbm_to_vmem [thread:$0]  %s199_s9, 16, %s1188_s21, [#allocation3] }
  0x64   : > { %s596_s10 = sshll.u32 %s1190_s17, 4  ;;  %s1036_s23 = smov [#allocation2 + $0x2]  }
  0x65   : > { %s255_s24 = sshll.u32 %s1036_s23, 4  ;;  %s221_s0 = scalar_lea.hbm %s1375_s1, %s596_s10  ;;  %s1222_s24 = int_to_ptr.vmem [resolvable:$true] %s255_s24 }
  0x66   : > { %s762_s11 = scalar_lea.hbm %s221_s0, 16  ;;  %p765_p5 = scmp.lt.u32.totalorder %s221_s0, %s1375_s1 }
  0x67   : > { %p763_p3 = scmp.ne.s32.totalorder %s221_s0, %s762_s11  ;;  %p766_p7 = scmp.lt.u32.totalorder %s1203_s2, %s762_s11 }
  0x68   : > { %p768_p13 = scmp.lt.u32.totalorder %s762_s11, %s221_s0 }
  0x69   : > { %p767_p11 = por %p766_p7, %p765_p5 }
  0x6b   : > { %p769_p0 = por %p768_p13, %p767_p11 }
  0x6d   : > { %p770_p2 = pnand %p769_p0, %p763_p3 }
  0x6f   : > { %773 = shalt.err (!%p770_p2)  }
  0x70   : > { %s774_s17 = scalar_lea.vmem %s1195_s25, 16  ;;  %p779_p6 = scmp.lt.s32.totalorder %s1195_s25, %s1188_s21 }
  0x71   : > { %p775_p4 = scmp.ne.s32.totalorder %s1195_s25, %s774_s17  ;;  %p780_p8 = scmp.lt.s32.totalorder %s1212_s13, %s774_s17 }
  0x73   : > { %p781_p9 = por %p780_p8, %p779_p6 }
  0x75   : > { %p782_p10 = pnand %p781_p9, %p775_p4 }
  0x77   : > { %785 = shalt.err (!%p782_p10)  }
  0x78   : > { %234 = dma.hbm_to_vmem [thread:$0]  %s221_s0, 16, %s1195_s25, [#allocation3 + $0x1] }
  0x79   : > { %s598_s9 = sshll.u32 %s1193_s26, 4  ;;  %s266_s16 = sadd.s32 3, %s1180_s18 }
  0x7a   : > { %s245_s6 = scalar_lea.hbm %s1375_s1, %s598_s9  ;;  %s1239_s27 = sld [smem:[#allocation5 + %s266_s16]] }
  0x7b   : > { %s786_s11 = scalar_lea.hbm %s245_s6, 16  ;;  %p789_p1 = scmp.lt.u32.totalorder %s245_s6, %s1375_s1 }
  0x7c   : > { %p787_p12 = scmp.ne.s32.totalorder %s245_s6, %s786_s11  ;;  %p790_p3 = scmp.lt.u32.totalorder %s1203_s2, %s786_s11 }
  0x7d   : > { %p792_p7 = scmp.lt.u32.totalorder %s786_s11, %s245_s6 }
  0x7e   : > { %p791_p5 = por %p790_p3, %p789_p1 }
  0x80   : > { %p793_p11 = por %p792_p7, %p791_p5 }
  0x82   : > { %p794_p13 = pnand %p793_p11, %p787_p12 }
  0x84   : > { %797 = shalt.err (!%p794_p13)  }
  0x85   : > { %s798_s25 = scalar_lea.vmem %s1222_s24, 16  ;;  %p803_p2 = scmp.lt.s32.totalorder %s1222_s24, %s1188_s21 }
  0x86   : > { %p799_p0 = scmp.ne.s32.totalorder %s1222_s24, %s798_s25  ;;  %p804_p4 = scmp.lt.s32.totalorder %s1212_s13, %s798_s25 }
  0x88   : > { %p805_p6 = por %p804_p4, %p803_p2 }
  0x8a   : > { %p806_p8 = pnand %p805_p6, %p799_p0 }
  0x8c   : > { %809 = shalt.err (!%p806_p8)  }
  0x8d   : > { %258 = dma.hbm_to_vmem [thread:$0]  %s245_s6, 16, %s1222_s24, [#allocation3 + $0x2] }
  0x8e   : > { %s290_s26 = sadd.s32 4, %s1180_s18  ;;  %s1037_s0 = smov [#allocation2 + $0x3]  }
  0x8f   : > { %s279_s17 = sshll.u32 %s1037_s0, 4  ;;  %s291_s9 = sld [smem:[#allocation5 + %s290_s26]]  ;;  %s280_s17 = int_to_ptr.vmem [resolvable:$true] %s279_s17 }
  0x90   : > { %s1038_s16 = smov [#allocation2 + $0x4]   ;;  %s314_s23 = sadd.s32 5, %s1180_s18 }
  0x91   : > { %s303_s10 = sshll.u32 %s1038_s16, 4  ;;  %s600_s11 = sshll.u32 %s1239_s27, 4  ;;  %s1254_s10 = int_to_ptr.vmem [resolvable:$true] %s303_s10 }
  0x92   : > { %s269_s25 = scalar_lea.hbm %s1375_s1, %s600_s11  ;;  %s1259_s7 = sld [smem:[#allocation5 + %s314_s23]] }
  0x93   : > { %s810_s15 = scalar_lea.hbm %s269_s25, 16  ;;  %p813_p10 = scmp.lt.u32.totalorder %s269_s25, %s1375_s1 }
  0x94   : > { %p811_p9 = scmp.ne.s32.totalorder %s269_s25, %s810_s15  ;;  %p814_p12 = scmp.lt.u32.totalorder %s1203_s2, %s810_s15 }
  0x95   : > { %p816_p3 = scmp.lt.u32.totalorder %s810_s15, %s269_s25 }
  0x96   : > { %p815_p1 = por %p814_p12, %p813_p10 }
  0x98   : > { %p817_p5 = por %p816_p3, %p815_p1 }
  0x9a   : > { %p818_p7 = pnand %p817_p5, %p811_p9 }
  0x9c   : > { %821 = shalt.err (!%p818_p7)  }
  0x9d   : > { %s822_s27 = scalar_lea.vmem %s280_s17, 16  ;;  %p827_p13 = scmp.lt.s32.totalorder %s280_s17, %s1188_s21 }
  0x9e   : > { %p823_p11 = scmp.ne.s32.totalorder %s280_s17, %s822_s27  ;;  %p828_p0 = scmp.lt.s32.totalorder %s1212_s13, %s822_s27 }
  0xa0   : > { %p829_p2 = por %p828_p0, %p827_p13 }
  0xa2   : > { %p830_p4 = pnand %p829_p2, %p823_p11 }
  0xa4   : > { %833 = shalt.err (!%p830_p4)  }
  0xa5   : > { %282 = dma.hbm_to_vmem [thread:$0]  %s269_s25, 16, %s280_s17, [#allocation3 + $0x3] }
  0xa6   : > { %s602_s26 = sshll.u32 %s291_s9, 4  ;;  %s1039_s15 = smov [#allocation2 + $0x5]  }
  0xa7   : > { %s293_s23 = scalar_lea.hbm %s1375_s1, %s602_s26  ;;  %s327_s11 = sshll.u32 %s1039_s15, 4  ;;  %s328_s11 = int_to_ptr.vmem [resolvable:$true] %s327_s11 }
  0xa8   : > { %s834_s20 = scalar_lea.hbm %s293_s23, 16  ;;  %p837_p8 = scmp.lt.u32.totalorder %s293_s23, %s1375_s1 }
  0xa9   : > { %p835_p6 = scmp.ne.s32.totalorder %s293_s23, %s834_s20  ;;  %p838_p9 = scmp.lt.u32.totalorder %s1203_s2, %s834_s20 }
  0xaa   : > { %p840_p12 = scmp.lt.u32.totalorder %s834_s20, %s293_s23 }
  0xab   : > { %p839_p10 = por %p838_p9, %p837_p8 }
  0xad   : > { %p841_p1 = por %p840_p12, %p839_p10 }
  0xaf   : > { %p842_p3 = pnand %p841_p1, %p835_p6 }
  0xb1   : > { %845 = shalt.err (!%p842_p3)  }
  0xb2   : > { %s846_s17 = scalar_lea.vmem %s1254_s10, 16  ;;  %p851_p7 = scmp.lt.s32.totalorder %s1254_s10, %s1188_s21 }
  0xb3   : > { %p847_p5 = scmp.ne.s32.totalorder %s1254_s10, %s846_s17  ;;  %p852_p11 = scmp.lt.s32.totalorder %s1212_s13, %s846_s17 }
  0xb5   : > { %p853_p13 = por %p852_p11, %p851_p7 }
  0xb7   : > { %p854_p0 = pnand %p853_p13, %p847_p5 }
  0xb9   : > { %857 = shalt.err (!%p854_p0)  }
  0xba   : > { %306 = dma.hbm_to_vmem [thread:$0]  %s293_s23, 16, %s1254_s10, [#allocation3 + $0x4] }
  0xbb   : > { %s338_s9 = sadd.s32 6, %s1180_s18  ;;  %s604_s25 = sshll.u32 %s1259_s7, 4 }
  0xbc   : > { %s339_s6 = sld [smem:[#allocation5 + %s338_s9]]  ;;  %s317_s0 = scalar_lea.hbm %s1375_s1, %s604_s25 }
  0xbd   : > { %s858_s16 = scalar_lea.hbm %s317_s0, 16  ;;  %p861_p4 = scmp.lt.u32.totalorder %s317_s0, %s1375_s1 }
  0xbe   : > { %p859_p2 = scmp.ne.s32.totalorder %s317_s0, %s858_s16  ;;  %p862_p6 = scmp.lt.u32.totalorder %s1203_s2, %s858_s16 }
  0xbf   : > { %p864_p9 = scmp.lt.u32.totalorder %s858_s16, %s317_s0 }
  0xc0   : > { %p863_p8 = por %p862_p6, %p861_p4 }
  0xc2   : > { %p865_p10 = por %p864_p9, %p863_p8 }
  0xc4   : > { %p866_p12 = pnand %p865_p10, %p859_p2 }
  0xc6   : > { %869 = shalt.err (!%p866_p12)  }
  0xc7   : > { %s870_s10 = scalar_lea.vmem %s328_s11, 16  ;;  %p875_p3 = scmp.lt.s32.totalorder %s328_s11, %s1188_s21 }
  0xc8   : > { %p871_p1 = scmp.ne.s32.totalorder %s328_s11, %s870_s10  ;;  %p876_p5 = scmp.lt.s32.totalorder %s1212_s13, %s870_s10 }
  0xca   : > { %p877_p7 = por %p876_p5, %p875_p3 }
  0xcc   : > { %p878_p11 = pnand %p877_p7, %p871_p1 }
  0xce   : > { %881 = shalt.err (!%p878_p11)  }
  0xcf   : > { %330 = dma.hbm_to_vmem [thread:$0]  %s317_s0, 16, %s328_s11, [#allocation3 + $0x5] }
  0xd0   : > { %s1040_s7 = smov [#allocation2 + $0x6]   ;;  %s362_s22 = sadd.s32 7, %s1180_s18 }
  0xd1   : > { %s351_s23 = sshll.u32 %s1040_s7, 4  ;;  %s363_s24 = sld [smem:[#allocation5 + %s362_s22]]  ;;  %s352_s23 = int_to_ptr.vmem [resolvable:$true] %s351_s23 }
  0xd2   : > { %s606_s17 = sshll.u32 %s339_s6, 4  ;;  %s1041_s9 = smov [#allocation2 + $0x7]  }
  0xd3   : > { %s375_s25 = sshll.u32 %s1041_s9, 4  ;;  %s341_s16 = scalar_lea.hbm %s1375_s1, %s606_s17  ;;  %s376_s25 = int_to_ptr.vmem [resolvable:$true] %s375_s25 }
  0xd4   : > { %s882_s15 = scalar_lea.hbm %s341_s16, 16  ;;  %p885_p0 = scmp.lt.u32.totalorder %s341_s16, %s1375_s1 }
  0xd5   : > { %p883_p13 = scmp.ne.s32.totalorder %s341_s16, %s882_s15  ;;  %p886_p2 = scmp.lt.u32.totalorder %s1203_s2, %s882_s15 }
  0xd6   : > { %p888_p6 = scmp.lt.u32.totalorder %s882_s15, %s341_s16 }
  0xd7   : > { %p887_p4 = por %p886_p2, %p885_p0 }
  0xd9   : > { %p889_p8 = por %p888_p6, %p887_p4 }
  0xdb   : > { %p890_p9 = pnand %p889_p8, %p883_p13 }
  0xdd   : > { %893 = shalt.err (!%p890_p9)  }
  0xde   : > { %s894_s11 = scalar_lea.vmem %s352_s23, 16  ;;  %p899_p12 = scmp.lt.s32.totalorder %s352_s23, %s1188_s21 }
  0xdf   : > { %p895_p10 = scmp.ne.s32.totalorder %s352_s23, %s894_s11  ;;  %p900_p1 = scmp.lt.s32.totalorder %s1212_s13, %s894_s11 }
  0xe1   : > { %p901_p3 = por %p900_p1, %p899_p12 }
  0xe3   : > { %p902_p5 = pnand %p901_p3, %p895_p10 }
  0xe5   : > { %905 = shalt.err (!%p902_p5)  }
  0xe6   : > { %354 = dma.hbm_to_vmem [thread:$0]  %s341_s16, 16, %s352_s23, [#allocation3 + $0x6] }
  0xe7   : > { %s608_s6 = sshll.u32 %s363_s24, 4 }
  0xe8   : > { %s365_s22 = scalar_lea.hbm %s1375_s1, %s608_s6 }
  0xe9   : > { %s906_s17 = scalar_lea.hbm %s365_s22, 16  ;;  %p909_p11 = scmp.lt.u32.totalorder %s365_s22, %s1375_s1 }
  0xea   : > { %p907_p7 = scmp.ne.s32.totalorder %s365_s22, %s906_s17  ;;  %p910_p13 = scmp.lt.u32.totalorder %s1203_s2, %s906_s17 }
  0xeb   : > { %p912_p2 = scmp.lt.u32.totalorder %s906_s17, %s365_s22 }
  0xec   : > { %p911_p0 = por %p910_p13, %p909_p11 }
  0xee   : > { %p913_p4 = por %p912_p2, %p911_p0 }
  0xf0   : > { %p914_p6 = pnand %p913_p4, %p907_p7 }
  0xf2   : > { %917 = shalt.err (!%p914_p6)  }
  0xf3   : > { %s918_s23 = scalar_lea.vmem %s376_s25, 16  ;;  %p923_p9 = scmp.lt.s32.totalorder %s376_s25, %s1188_s21 }
  0xf4   : > { %p919_p8 = scmp.ne.s32.totalorder %s376_s25, %s918_s23  ;;  %p924_p10 = scmp.lt.s32.totalorder %s1212_s13, %s918_s23 }
  0xf6   : > { %p925_p12 = por %p924_p10, %p923_p9 }
  0xf8   : > { %p926_p1 = pnand %p925_p12, %p919_p8 }
  0xfa   : > { %929 = shalt.err (!%p926_p1)  }
  0xfb   : > { %378 = dma.hbm_to_vmem [thread:$0]  %s365_s22, 16, %s376_s25, [#allocation3 + $0x7] }
  0xfc   : > { %s188_s24 = scalar_lea.vmem [#allocation9], %s1184_s19 }
  0xfd   : > { %988 = dma.done.wait [#allocation3], 16 }
  0xfe   : > { %989 = vsyncadd [#allocation3], 4294967280 }
  0xff   : > { %990 = dma.done.wait [#allocation3 + $0x1], 16 }
 0x100   : > { %991 = vsyncadd [#allocation3 + $0x1], 4294967280 }
 0x101   : > { %992 = dma.done.wait [#allocation3 + $0x2], 16 }
 0x102   : > { %993 = vsyncadd [#allocation3 + $0x2], 4294967280 }
 0x103   : > { %994 = dma.done.wait [#allocation3 + $0x3], 16 }
 0x104   : > { %995 = vsyncadd [#allocation3 + $0x3], 4294967280 }
 0x105   : > { %996 = dma.done.wait [#allocation3 + $0x4], 16 }
 0x106   : > { %997 = vsyncadd [#allocation3 + $0x4], 4294967280 }
 0x107   : > { %998 = dma.done.wait [#allocation3 + $0x5], 16 }
 0x108   : > { %999 = vsyncadd [#allocation3 + $0x5], 4294967280 }
 0x109   : > { %1000 = dma.done.wait [#allocation3 + $0x6], 16 }
 0x10a   : > { %1001 = vsyncadd [#allocation3 + $0x6], 4294967280 }
 0x10b   : > { %1002 = dma.done.wait [#allocation3 + $0x7], 16 }
 0x10c   : > { %1003 = vsyncadd [#allocation3 + $0x7], 4294967280  ;;  %v395_v0 = vld [vmem:[#allocation2] sm:$0xff]  ;;  %v396_v1 = vld [vmem:[#allocation6] sm:$0xff]  ;;  %s445_s26 = sshll.u32 %s188_s24, 4  ;;  %s1323_s20 = scalar_lea.hbm %s1379_s5, %s1180_s18  ;;  %s1325_s26 = int_to_ptr.vmem [resolvable:$true] %s445_s26 }
 0x10d   : > { %v397_v2 = vadd.f32 %v396_v1, %v395_v0  ;;  %v609_v14 = vld [vmem:[%s1377_s3] ss:$0 sm:$0xff]  ;;  %s1399_s10 = sand.u32 1, %s1014_s29   ;;  %s930_s6 = scalar_lea.vmem %s1325_s26, 128 }
 0x10e   : > { %v610_v16 = vld [vmem:[%s1378_s4] ss:$0 sm:$0xff]  ;;  %s431_s11 = scalar_lea.sflag [#allocation8], %s1399_s10  ;;  %p931_p3 = scmp.ne.s32.totalorder %s1325_s26, %s930_s6 }
 0x10f   : > { %400 = vadd.xlane.f32.xlu0 %v397_v2  ;;  %v404_v3 = vmul.f32 %v397_v2, %v397_v2  ;;  %p1400_p5 = scmp.ne.s32.totalorder %s1390_s12, 0  ;;  %s1042_s0 = smov [#allocation9]  }
 0x110   : > { %s934_s7 = sshll.u32 %s1042_s0, 4  ;;  %s935_s7 = int_to_ptr.vmem [resolvable:$false] %s934_s7 }
 0x111   : > { %p932_p7 = pnand %p931_p3, %p1400_p5  ;;  %s936_s22 = scalar_lea.vmem %s935_s7, 256 }
 0x112   : > { %p937_p13 = scmp.lt.s32.totalorder %s1325_s26, %s935_s7  ;;  %p938_p0 = scmp.lt.s32.totalorder %s936_s22, %s930_s6 }
 0x113   : > { %405 = vadd.xlane.f32.xlu0 %v404_v3  ;;  %p933_p11 = pneg %p932_p7 }
 0x114   : > { %p939_p2 = por %p938_p0, %p937_p13 }
 0x116   : > { %p940_p4 = pnand %p939_p2, %p933_p11 }
 0x19c   : > { %v401_v4 = vpop.xlane.xlu0 %400 }
 0x19d   : > { %v403_v5 = vmul.f32 0.0078125, %v401_v4 }
 0x19f   : > { %v408_v7 = vmul.f32 %v403_v5, %v403_v5  ;;  %v411_v12 = vsub.f32 %v397_v2, %v403_v5 }
 0x1a0   : > { %v406_v6 = vpop.xlane.xlu0 %405 }
 0x1a1   : > { %v407_v8 = vmul.f32 0.0078125, %v406_v6 }
 0x1a3   : > { %v409_v9 = vsub.f32 %v407_v8, %v408_v7 }
 0x1a5   : > { %v410_v10 = vmax.f32 %v409_v9, 0.0 }
 0x1a7   : > { %v412_v11 = vadd.f32 1e-05, %v410_v10 }
 0x1a9   : > { %698 = vrsqrt.f32 %v412_v11 }
 0x1b3   : > { %v699_v13 = vpop.eup %698 }
 0x1b4   : > { %v414_v15 = vmul.f32 %v699_v13, %v411_v12 }
 0x1b6   : > { %v421_v17 = vmul.f32 %v609_v14, %v414_v15 }
 0x1b8   : > { %v428_v18 = vadd.f32 %v610_v16, %v421_v17 }
 0x1ba   : > { %429 = vst [vmem:[%s188_s24] sm:$0xff] %v428_v18 }
 0x1bb   : > { %943 = shalt.err (!%p940_p4)
}
 0x1bc   : > { %s944_s18 = scalar_lea.hbm %s1323_s20, 128  ;;  %s948_s9 = scalar_lea.hbm %s1379_s5, 256 }
 0x1bd   : > { %p945_p6 = scmp.ne.s32.totalorder %s1323_s20, %s944_s18  ;;  %p949_p10 = scmp.lt.u32.totalorder %s1323_s20, %s1379_s5 }
 0x1be   : > { %p950_p12 = scmp.lt.u32.totalorder %s948_s9, %s944_s18  ;;  %p952_p3 = scmp.lt.u32.totalorder %s944_s18, %s1323_s20 }
 0x1bf   : > { %p946_p8 = pnand %p945_p6, %p1400_p5 }
 0x1c0   : > { %p951_p1 = por %p950_p12, %p949_p10 }
 0x1c1   : > { %p947_p9 = pneg %p946_p8 }
 0x1c2   : > { %p953_p7 = por %p952_p3, %p951_p1 }
 0x1c4   : > { %p954_p11 = pnand %p953_p7, %p947_p9 }
 0x1c6   : > { %957 = shalt.err (!%p954_p11)
}
 0x1c7   : > { %627 = dma.vmem_to_hbm [thread:$0]  (%p1400_p5), %s1325_s26, 128, %s1323_s20, %s431_s11  }
 0x1c8 PF: > { %p639_p13 = scmp.ge.s32.totalorder %s1030_s8, 2  ;;  %s457_s24 = sand.u32 1, %s1010_s28  }
 0x1c9   : > { %p1401_p0 = scmp.ne.s32.totalorder %s1391_s14, 0  ;;  %s458_s2 = scalar_lea.sflag [#allocation8], %s457_s24 }
 0x1cb   : > { %p634_p2 = pnand %p639_p13, %p1401_p0 }
 0x1cd   : > { %1005 = dma.done.wait (!%p634_p2), %s458_s2, 128  }
 0x1ce   : > { %1007 = vsyncadd (!%p634_p2), %s458_s2, 4294967168  ;;  %s23_s8 = sadd.s32 1, %s1030_s8   ;;  %s1402_s12 = sld [smem:[#allocation41_spill]] }
 0x1cf   : > { %p20_p4 = scmp.ge.s32.totalorder %s23_s8, 4   ;;  %s1403_s6 = sld [smem:[#allocation39_spill]] }
 0x1d0   : > { %s1404_s7 = sld [smem:[#allocation40_spill]]  ;;  %s1405_s28 = smov %s1014_s29 }
 0x1d1   : > { %s1406_s29 = smov %s1018_s30  ;;  %22 = sbr.rel (!%p20_p4) target bundleno = 17 (0x11), region = 131 }
 0x1d4   : > { %s1407_s30 = smov %s1402_s12 }
 0x1d8   :  { %463 = vsyncpa [#allocation7], 1 }
 0x1d9   :  { %465 = vsyncpa [#allocation7 + $0x1], 1 }
 0x1da   :  { %466 = vsyncpa [#allocation8], 1 }
 0x1db   :  { %468 = vsyncpa [#allocation8 + $0x1], 1 }
 0x1dc   :  { %469 = vsyncmov [#allocation3] }
 0x1df   :  { %s470_s14 = vpop.sfrf %469 }
 0x1e0   :  { %p615_p5 = scmp.ne.s32.totalorder %s470_s14, 0 }
 0x1e2   :  { %474 = shalt.err (%p615_p5)  }
 0x1e3   :  { %476 = vsyncmov [#allocation3 + $0x1] }
 0x1e6   :  { %s477_s21 = vpop.sfrf %476 }
 0x1e7   :  { %p616_p6 = scmp.ne.s32.totalorder %s477_s21, 0 }
 0x1e9   :  { %481 = shalt.err (%p616_p6)  }
 0x1ea   :  { %483 = vsyncmov [#allocation3 + $0x2] }
 0x1ed   :  { %s484_s13 = vpop.sfrf %483 }
 0x1ee   :  { %p617_p8 = scmp.ne.s32.totalorder %s484_s13, 0 }
 0x1f0   :  { %488 = shalt.err (%p617_p8)  }
 0x1f1   :  { %490 = vsyncmov [#allocation3 + $0x3] }
 0x1f4   :  { %s491_s25 = vpop.sfrf %490 }
 0x1f5   :  { %p618_p9 = scmp.ne.s32.totalorder %s491_s25, 0 }
 0x1f7   :  { %495 = shalt.err (%p618_p9)  }
 0x1f8   :  { %497 = vsyncmov [#allocation3 + $0x4] }
 0x1fb   :  { %s498_s1 = vpop.sfrf %497 }
 0x1fc   :  { %p619_p10 = scmp.ne.s32.totalorder %s498_s1, 0 }
 0x1fe   :  { %502 = shalt.err (%p619_p10)  }
 0x1ff   :  { %504 = vsyncmov [#allocation3 + $0x5] }
 0x202   :  { %s505_s3 = vpop.sfrf %504 }
 0x203   :  { %p620_p12 = scmp.ne.s32.totalorder %s505_s3, 0 }
 0x205   :  { %509 = shalt.err (%p620_p12)  }
 0x206   :  { %511 = vsyncmov [#allocation3 + $0x6] }
 0x209   :  { %s512_s4 = vpop.sfrf %511 }
 0x20a   :  { %p621_p1 = scmp.ne.s32.totalorder %s512_s4, 0 }
 0x20c   :  { %516 = shalt.err (%p621_p1)  }
 0x20d   :  { %518 = vsyncmov [#allocation3 + $0x7] }
 0x210   :  { %s519_s5 = vpop.sfrf %518 }
 0x211   :  { %p622_p3 = scmp.ne.s32.totalorder %s519_s5, 0 }
 0x213   :  { %523 = shalt.err (%p622_p3)  }

</bundles_post_ra>
